<compile_context>
chip_gen: v5e
topology: v5e:2x2
jax: 0.10.0
libtpu: 0.0.40
codegen_flags: <defaults>
</compile_context>

<pallas_src>
import functools

import jax
import jax.numpy as jnp
from jax import lax
from jax.experimental import pallas as pl
from jax.experimental.pallas import tpu as pltpu

HIDDEN = 128  # matches nn.Linear(input_dim, 128)


def _round_up(x, m):
    return ((x + m - 1) // m) * m


def policy_mlp_kernel(x_ref, w1_ref, w2_ref, b2_ref, logits_ref, probs_ref, *, d_out):
    # x_ref     : (block_b, K_pad)  activations; ones column at d_in (bias fold), zero pad
    # w1_ref    : (K_pad, 128)      W1 with b1 folded in as row d_in, zero-padded rows
    # w2_ref    : (128, N_pad)      W2 zero-padded to 128 output lanes
    # b2_ref    : (1, N_pad)        b2 zero-padded (always f32)
    # logits_ref: (block_b, N_pad)  lane-dense logits (valid cols [:d_out])
    # probs_ref : (block_b, N_pad)  softmax over the d_out valid lanes
    # Layer 1: bias already folded into the matmul; f32 MXU accumulation.
    h = jnp.dot(x_ref[...], w1_ref[...], preferred_element_type=jnp.float32)
    h = jnp.maximum(h, 0.0).astype(w2_ref.dtype)   # ReLU on VPU; bf16 feed if enabled
    # Layer 2: lane-dense (block_b, N_pad) tile — unmasked store path.
    y = jnp.dot(h, w2_ref[...], preferred_element_type=jnp.float32) + b2_ref[...]
    logits_ref[...] = y.astype(logits_ref.dtype)

    # Fused action head: numerically stable softmax over the valid d_out lanes.
    col = lax.broadcasted_iota(jnp.int32, y.shape, 1)
    y_masked = jnp.where(col < d_out, y, jnp.float32(-1e30))
    m = jnp.max(y_masked, axis=-1, keepdims=True)          # XLU reduce
    e = jnp.exp(y_masked - m)                               # EUP
    denom = jnp.sum(e, axis=-1, keepdims=True)              # XLU reduce
    probs_ref[...] = (e * pl.reciprocal(denom, approx=True)).astype(probs_ref.dtype)


def init_policy_params(key, input_dim, output_dim, hidden=HIDDEN):
    """nn.Linear-style init: U(+-1/sqrt(fan_in)), stored as (in, out) for x @ W."""
    k1, k2, k3, k4 = jax.random.split(key, 4)
    bound1 = 1.0 / jnp.sqrt(input_dim)
    bound2 = 1.0 / jnp.sqrt(hidden)
    w1 = jax.random.uniform(k1, (input_dim, hidden), jnp.float32, -bound1, bound1)
    b1 = jax.random.uniform(k2, (hidden,), jnp.float32, -bound1, bound1)
    w2 = jax.random.uniform(k3, (hidden, output_dim), jnp.float32, -bound2, bound2)
    b2 = jax.random.uniform(k4, (output_dim,), jnp.float32, -bound2, bound2)
    return w1, b1, w2, b2


def pack_policy_params(w1, b1, w2, b2, compute_dtype=jnp.float32):
    """Pad/fold the raw Linear params into MXU/lane-friendly tensors.

    Returns (w1a, w2p, b2p, d_in, d_out) where
      w1a: (K_pad, H) = [W1 ; b1 ; 0...]  (bias folded in, K padded to a sublane multiple)
      w2p: (H, N_pad) = [W2 | 0]          (output padded to 128 lanes)
      b2p: (1, N_pad) = [b2 | 0]          (kept f32)
    Zero padding guarantees the sliced logits equal the unpadded math.
    """
    d_in, hidden = w1.shape
    d_out = w2.shape[1]
    k_pad = _round_up(d_in + 1, 8)
    n_pad = _round_up(d_out, 128)
    w1a = jnp.zeros((k_pad, hidden), jnp.float32)
    w1a = w1a.at[:d_in, :].set(w1).at[d_in, :].set(jnp.reshape(b1, (-1,)))
    w2p = jnp.zeros((hidden, n_pad), jnp.float32).at[:, :d_out].set(w2)
    b2p = jnp.zeros((1, n_pad), jnp.float32).at[:, :d_out].set(jnp.reshape(b2, (1, -1)))
    return (w1a.astype(compute_dtype), w2p.astype(compute_dtype), b2p, d_in, d_out)


def policy_network_forward(x, packed):
    """x: (B, d_in) float -> (logits (B, d_out) f32, probs (B, d_out) f32)."""
    w1a, w2p, b2p, d_in, d_out = packed
    if x.ndim == 1:          # get_action-style single state
        x = x[None, :]
    B = x.shape[0]
    k_pad, hidden = w1a.shape
    n_pad = w2p.shape[1]

    # Batch tiling: sublane-aligned blocks of up to 256 rows; batch-parallel grid
    # (v7x's two TensorCores each take alternating blocks).
    block_b = min(_round_up(max(B, 1), 8), 256)
    b_pad = _round_up(B, block_b)
    grid = (b_pad // block_b,)

    # Augment x: ones column folds b1 into W1; zero-padded rows/cols are inert.
    x_aug = jnp.zeros((b_pad, k_pad), w1a.dtype)
    x_aug = x_aug.at[:B, :d_in].set(x.astype(w1a.dtype))
    x_aug = x_aug.at[:B, d_in].set(1.0)

    kernel = functools.partial(policy_mlp_kernel, d_out=d_out)
    flops = 2 * b_pad * (k_pad * hidden + hidden * n_pad)
    bytes_accessed = 4 * (b_pad * k_pad + k_pad * hidden + hidden * n_pad
                          + n_pad + 2 * b_pad * n_pad)

    logits_pad, probs_pad = pl.pallas_call(
        kernel,
        out_shape=(
            jax.ShapeDtypeStruct((b_pad, n_pad), jnp.float32),
            jax.ShapeDtypeStruct((b_pad, n_pad), jnp.float32),
        ),
        grid=grid,
        in_specs=[
            pl.BlockSpec((block_b, k_pad), lambda i: (i, 0)),   # batch-tiled activations
            pl.BlockSpec((k_pad, hidden), lambda i: (0, 0)),    # resident weights
            pl.BlockSpec((hidden, n_pad), lambda i: (0, 0)),
            pl.BlockSpec((1, n_pad), lambda i: (0, 0)),
        ],
        out_specs=(
            pl.BlockSpec((block_b, n_pad), lambda i: (i, 0)),
            pl.BlockSpec((block_b, n_pad), lambda i: (i, 0)),
        ),
        compiler_params=pltpu.CompilerParams(dimension_semantics=("parallel",)),
        cost_estimate=pl.CostEstimate(
            flops=flops, transcendentals=b_pad * n_pad, bytes_accessed=bytes_accessed),
    )(x_aug, w1a, w2p, b2p)

    return logits_pad[:B, :d_out], probs_pad[:B, :d_out]


if __name__ == "__main__":
    key = jax.random.PRNGKey(0)
    kx, kp, kb = jax.random.split(key, 3)

    input_dim, output_dim = 4, 2          # CartPole-style state / action dims
    w1, b1, w2, b2 = init_policy_params(kp, input_dim, output_dim)

    def ref_forward(xv):
        logits = jnp.maximum(xv @ w1 + b1, 0.0) @ w2 + b2
        return logits, jax.nn.softmax(logits, axis=-1)

    # 1) Module-consistent small shape (B=2), f32.
    packed_f32 = pack_policy_params(w1, b1, w2, b2)
    x_small = jax.random.normal(kx, (2, input_dim), jnp.float32)
    logits, probs = policy_network_forward(x_small, packed_f32)
    jax.block_until_ready(logits)
    ref_logits, ref_probs = ref_forward(x_small)
    assert logits.shape == (2, output_dim) and probs.shape == (2, output_dim)
    assert jnp.allclose(logits, ref_logits, atol=1e-4, rtol=1e-4)
    assert jnp.allclose(probs, ref_probs, atol=2e-3, rtol=2e-3)

    # 2) Rollout-style batch (B=512 -> grid of two 256-row blocks), f32.
    x_big = jax.random.normal(kb, (512, input_dim), jnp.float32)
    logits_b, probs_b = policy_network_forward(x_big, packed_f32)
    jax.block_until_ready(logits_b)
    ref_logits_b, ref_probs_b = ref_forward(x_big)
    assert jnp.allclose(logits_b, ref_logits_b, atol=1e-4, rtol=1e-4)
    assert jnp.allclose(probs_b, ref_probs_b, atol=2e-3, rtol=2e-3)

    # 3) bf16 operands (v6e MXU-rate path), f32 accumulation — loose tolerance.
    packed_bf16 = pack_policy_params(w1, b1, w2, b2, compute_dtype=jnp.bfloat16)
    logits_h, _ = policy_network_forward(x_big, packed_bf16)
    jax.block_until_ready(logits_h)
    assert jnp.allclose(logits_h, ref_logits_b, atol=5e-2, rtol=5e-2)

    # TODO(synk): in-kernel categorical sampling + log_prob (pltpu.prng_seed /
    # prng_random_bits) for get_action is left out; sample host-side from probs.
    print("KERNEL_OK")
</pallas_src>

<mosaic_0001>
module attributes {stable_mosaic.version = 11 : i64} {
  func.func @policy_mlp_kernel(%arg0: i32, %arg1: memref<8x8xf32, #tpu.memory_space<vmem>>, %arg2: memref<8x128xf32, #tpu.memory_space<vmem>>, %arg3: memref<128x128xf32, #tpu.memory_space<vmem>>, %arg4: memref<1x128xf32, #tpu.memory_space<vmem>>, %arg5: memref<8x128xf32, #tpu.memory_space<vmem>>, %arg6: memref<8x128xf32, #tpu.memory_space<vmem>>) attributes {dimension_semantics = [#tpu.dimension_semantics<parallel>], iteration_bounds = array<i64: 1>, scalar_prefetch = 0 : i64, scratch_operands = 0 : i64, tpu.core_type = #tpu.core_type<tc>, window_params = [{transform_indices = @transform_0, window_bounds = array<i64: 8, 8>}, {pipeline_mode = #tpu.pipeline_mode<synchronous>, transform_indices = @transform_1, window_bounds = array<i64: 8, 128>}, {pipeline_mode = #tpu.pipeline_mode<synchronous>, transform_indices = @transform_2, window_bounds = array<i64: 128, 128>}, {pipeline_mode = #tpu.pipeline_mode<synchronous>, transform_indices = @transform_3, window_bounds = array<i64: 1, 128>}, {transform_indices = @transform_4, window_bounds = array<i64: 8, 128>}, {transform_indices = @transform_5, window_bounds = array<i64: 8, 128>}]} {
    %c0 = arith.constant 0 : index
    %c0_0 = arith.constant 0 : index
    %0 = vector.load %arg1[%c0, %c0_0] : memref<8x8xf32, #tpu.memory_space<vmem>>, vector<8x8xf32>
    %c0_1 = arith.constant 0 : index
    %c0_2 = arith.constant 0 : index
    %1 = vector.load %arg2[%c0_1, %c0_2] : memref<8x128xf32, #tpu.memory_space<vmem>>, vector<8x128xf32>
    %cst = arith.constant dense<0.000000e+00> : vector<8x128xf32>
    %2 = tpu.matmul %0, %1, %cst {dimension_numbers = #tpu.dot_dimension_numbers<[1], [0], [0], [1], [0, 0, 1, 1], [], []>} : vector<8x8xf32>, vector<8x128xf32>, vector<8x128xf32> -> vector<8x128xf32>
    %cst_3 = arith.constant 0.000000e+00 : f32
    %3 = vector.broadcast %cst_3 : f32 to vector<8x128xf32>
    %4 = arith.maximumf %2, %3 : vector<8x128xf32>
    %c0_4 = arith.constant 0 : index
    %c0_5 = arith.constant 0 : index
    %5 = vector.load %arg3[%c0_4, %c0_5] : memref<128x128xf32, #tpu.memory_space<vmem>>, vector<128x128xf32>
    %cst_6 = arith.constant dense<0.000000e+00> : vector<8x128xf32>
    %6 = tpu.matmul %4, %5, %cst_6 {dimension_numbers = #tpu.dot_dimension_numbers<[1], [0], [0], [1], [0, 0, 1, 1], [], []>} : vector<8x128xf32>, vector<128x128xf32>, vector<8x128xf32> -> vector<8x128xf32>
    %c0_7 = arith.constant 0 : index
    %c0_8 = arith.constant 0 : index
    %7 = vector.load %arg4[%c0_7, %c0_8] : memref<1x128xf32, #tpu.memory_space<vmem>>, vector<1x128xf32>
    %8 = vector.broadcast %7 : vector<1x128xf32> to vector<8x128xf32>
    %9 = arith.addf %6, %8 : vector<8x128xf32>
    %c0_9 = arith.constant 0 : index
    %c0_10 = arith.constant 0 : index
    %10 = vector.load %arg5[%c0_9, %c0_10] : memref<8x128xf32, #tpu.memory_space<vmem>>, vector<8x128xf32>
    tpu.vector_store %arg5[%c0_9, %c0_10], %9 {strides = array<i32>} : memref<8x128xf32, #tpu.memory_space<vmem>>, vector<8x128xf32>,
    %11 = tpu.iota {dimensions = array<i32: 1>} : vector<8x128xi32>
    %c2_i32 = arith.constant 2 : i32
    %12 = vector.broadcast %c2_i32 : i32 to vector<8x128xi32>
    %13 = arith.cmpi slt, %11, %12 : vector<8x128xi32>
    %cst_11 = arith.constant -1.000000e+30 : f32
    %14 = vector.broadcast %cst_11 : f32 to vector<8x128xf32>
    %15 = arith.select %13, %9, %14 : vector<8x128xi1>, vector<8x128xf32>
    %cst_12 = arith.constant dense<0xFF800000> : vector<8xf32>
    %16 = vector.multi_reduction <maximumf>, %15, %cst_12 [1] : vector<8x128xf32> to vector<8xf32>
    %17 = vector.shape_cast %16 : vector<8xf32> to vector<8x1xf32>
    %18 = vector.broadcast %17 : vector<8x1xf32> to vector<8x128xf32>
    %19 = arith.subf %15, %18 : vector<8x128xf32>
    %20 = math.exp %19 : vector<8x128xf32>
    %cst_13 = arith.constant dense<0.000000e+00> : vector<8xf32>
    %21 = vector.multi_reduction <add>, %20, %cst_13 [1] : vector<8x128xf32> to vector<8xf32>
    %22 = vector.shape_cast %21 : vector<8xf32> to vector<8x1xf32>
    %23 = tpu.reciprocal %22 {approx = true} : vector<8x1xf32> -> vector<8x1xf32>
    %24 = vector.broadcast %23 : vector<8x1xf32> to vector<8x128xf32>
    %25 = arith.mulf %20, %24 : vector<8x128xf32>
    %c0_14 = arith.constant 0 : index
    %c0_15 = arith.constant 0 : index
    %26 = vector.load %arg6[%c0_14, %c0_15] : memref<8x128xf32, #tpu.memory_space<vmem>>, vector<8x128xf32>
    tpu.vector_store %arg6[%c0_14, %c0_15], %25 {strides = array<i32>} : memref<8x128xf32, #tpu.memory_space<vmem>>, vector<8x128xf32>,
    return
  }
  func.func @transform_0(%arg0: i32) -> (i32, i32) {
    %c0_i32 = arith.constant 0 : i32
    %c0_i32_0 = arith.constant 0 : i32
    return %arg0, %c0_i32 : i32, i32
  }
  func.func @transform_1(%arg0: i32) -> (i32, i32) {
    %c0_i32 = arith.constant 0 : i32
    %c0_i32_0 = arith.constant 0 : i32
    %c0_i32_1 = arith.constant 0 : i32
    return %c0_i32, %c0_i32_0 : i32, i32
  }
  func.func @transform_2(%arg0: i32) -> (i32, i32) {
    %c0_i32 = arith.constant 0 : i32
    %c0_i32_0 = arith.constant 0 : i32
    %c0_i32_1 = arith.constant 0 : i32
    return %c0_i32, %c0_i32_0 : i32, i32
  }
  func.func @transform_3(%arg0: i32) -> (i32, i32) {
    %c0_i32 = arith.constant 0 : i32
    %c0_i32_0 = arith.constant 0 : i32
    %c0_i32_1 = arith.constant 0 : i32
    return %c0_i32, %c0_i32_0 : i32, i32
  }
  func.func @transform_4(%arg0: i32) -> (i32, i32) {
    %c0_i32 = arith.constant 0 : i32
    %c0_i32_0 = arith.constant 0 : i32
    return %arg0, %c0_i32 : i32, i32
  }
  func.func @transform_5(%arg0: i32) -> (i32, i32) {
    %c0_i32 = arith.constant 0 : i32
    %c0_i32_0 = arith.constant 0 : i32
    return %arg0, %c0_i32 : i32, i32
  }
}

</mosaic_0001>

<bundles_post_ra>
// kernel: tpu_custom_call.1
= control target key start
LH: loop header
LB: loop body
LE: loop exit
PB: predicated region body
PF: predicated region fallthrough
CT: control target
= control target key end

     0   :  { %11 = vsyncpa [#allocation3], 0  ;;  %s376_s0 = inlined_call_operand.hbm [shape: f32[8,8], index: 0, kind: input, shape index: {}]   ;;  %s377_s1 = inlined_call_operand.hbm [shape: f32[8,128], index: 1, kind: input, shape index: {}]   ;;  %s378_s2 = inlined_call_operand.hbm [shape: f32[128,128], index: 2, kind: input, shape index: {}]   ;;  %s379_s3 = inlined_call_operand.vmem [shape: f32[1,128], index: 3, kind: input, shape index: {}]   ;;  %s380_s4 = inlined_call_operand.hbm [shape: f32[8,128], index: 4, kind: output, shape index: {0}]   ;;  %s381_s5 = inlined_call_operand.hbm [shape: f32[8,128], index: 5, kind: output, shape index: {1}]  }
   0x1   :  { %12 = vsyncpa [#allocation6], 0 }
   0x2   :  { %13 = vsyncpa [#allocation4], 0  ;;  %s31_s20 = sshll.u32 %s377_s1, 4  ;;  %s32_s20 = int_to_ptr.hbm [resolvable:$true] %s31_s20 }
   0x3   :  { %14 = vsyncpa [#allocation10], 0  ;;  %s321_s21 = smov [#allocation5]   ;;  %s20_s25 = sshll.u32 %s376_s0, 4  ;;  %s21_s25 = int_to_ptr.hbm [resolvable:$true] %s20_s25 }
   0x4   :  { %s33_s22 = sshll.u32 %s321_s21, 4  ;;  %s322_s26 = smov [#allocation2]   ;;  %s34_s22 = int_to_ptr.vmem [resolvable:$true] %s33_s22 }
   0x5   :  { %36 = dma.hbm_to_vmem [thread:$0]  %s32_s20, 128, %s34_s22, [#allocation6]  }
   0x6   :  { %s22_s27 = sshll.u32 %s322_s26, 4  ;;  %s41_s30 = sshll.u32 %s378_s2, 4  ;;  %s23_s27 = int_to_ptr.vmem [resolvable:$true] %s22_s27  ;;  %s42_s30 = int_to_ptr.hbm [resolvable:$true] %s41_s30 }
   0x7   :  { %25 = dma.hbm_to_vmem [thread:$0]  %s21_s25, 128, %s23_s27, [#allocation3]  }
   0x8   :  { %s323_s1 = smov [#allocation7]   ;;  %s324_s7 = smov 128  }
   0x9   :  { %s43_s6 = sshll.u32 %s323_s1, 4  ;;  %s325_s8 = smov 8   ;;  %s44_s6 = int_to_ptr.vmem [resolvable:$true] %s43_s6 }
   0xa   :  { %49 = dma.hbm_to_vmem [thread:$0]  %s42_s30, 2048, %s44_s6, [#allocation6], %s324_s7, %s324_s7, %s325_s8  }
   0xb   :  { %313 = dma.done.wait [#allocation3], 128  }
   0xc   :  { %314 = vsyncadd [#allocation3], 4294967168 }
   0xd   :  { %315 = dma.done.wait [#allocation6], 2176  }
   0xe   :  { %316 = vsyncadd [#allocation6], 4294965120  ;;  %vm66_vm0 = vcmask 64512   ;;  %v65_v0 = vld [vmem:[#allocation5] sm:$0xff]  ;;  %v64_v1 = vld [vmem:[#allocation2] sm:$0xff]  ;;  %v132_v20 = vlaneseq  ;;  %s153_s11 = sshll.u32 %s380_s4, 4  ;;  %s154_s11 = int_to_ptr.hbm [resolvable:$true] %s153_s11 }
   0xf   :  { %v106_v2 = vld [vmem:[#allocation7 + $0x78] sm:$0xff]  ;;  %85 = vmatpush.msra.mxu0 %v65_v0  ;;  %v105_v3 = vld [vmem:[#allocation7 + $0x70] sm:$0xff]  ;;  %v104_v4 = vld [vmem:[#allocation7 + $0x68] sm:$0xff]  ;;  %s326_s12 = smov [#allocation8]   ;;  %s164_s17 = sshll.u32 %s381_s5, 4  ;;  %s165_s17 = int_to_ptr.hbm [resolvable:$true] %s164_s17 }
  0x10   :  { %111 = vmatpush.msra.mxu1 %v106_v2  ;;  %180 = vmatmul.msk.f32.vlgmr.msra.gmra.mxu0 %vm66_vm0, %v64_v1  ;;  %v103_v5 = vld [vmem:[#allocation7 + $0x60] sm:$0xff]  ;;  %v102_v6 = vld [vmem:[#allocation7 + $0x58] sm:$0xff]  ;;  %v101_v7 = vld [vmem:[#allocation7 + $0x50] sm:$0xff]  ;;  %v133_v21 = vand.u32 127, %v132_v20  ;;  %s151_s13 = sshll.u32 %s326_s12, 4  ;;  %s152_s13 = int_to_ptr.vmem [resolvable:$true] %s151_s13 }
  0x11   :  { %v100_v8 = vld [vmem:[#allocation7 + $0x48] sm:$0xff]  ;;  %v99_v9 = vld [vmem:[#allocation7 + $0x40] sm:$0xff]  ;;  %v98_v10 = vld [vmem:[#allocation7 + $0x38] sm:$0xff] }
  0x12   :  { %112 = vmatpush.msra.mxu1 %v105_v3  ;;  %v97_v11 = vld [vmem:[#allocation7 + $0x30] sm:$0xff]  ;;  %v96_v12 = vld [vmem:[#allocation7 + $0x28] sm:$0xff]  ;;  %v95_v13 = vld [vmem:[#allocation7 + $0x20] sm:$0xff]  ;;  %vm134_vm1 = vcmp.lt.s32.totalorder %v133_v21, 2 }
  0x13   :  { %v94_v14 = vld [vmem:[#allocation7 + $0x18] sm:$0xff]  ;;  %v93_v15 = vld [vmem:[#allocation7 + $0x10] sm:$0xff]  ;;  %v92_v16 = vld [vmem:[#allocation7 + $0x8] sm:$0xff] }
  0x14   :  { %113 = vmatpush.msra.mxu1 %v104_v4  ;;  %v91_v17 = vld [vmem:[#allocation7] sm:$0xff]  ;;  %v188_v22 = vld [vmem:[%s379_s3] ss:$0 sm:$0xff]  ;;  %s327_s3 = smov [#allocation9]  }
  0x15   :  { %s162_s14 = sshll.u32 %s327_s3, 4  ;;  %s163_s14 = int_to_ptr.vmem [resolvable:$true] %s162_s14 }
  0x16   :  { %114 = vmatpush.msra.mxu1 %v103_v5 }
  0x18   :  { %115 = vmatpush.msra.mxu1 %v102_v6 }
  0x1a   :  { %116 = vmatpush.msra.mxu1 %v101_v7 }
  0x1c   :  { %117 = vmatpush.msra.mxu1 %v100_v8 }
  0x1e   :  { %118 = vmatpush.msra.mxu1 %v99_v9 }
  0x20   :  { %119 = vmatpush.msra.mxu1 %v98_v10 }
  0x22   :  { %120 = vmatpush.msra.mxu1 %v97_v11 }
  0x24   :  { %121 = vmatpush.msra.mxu1 %v96_v12 }
  0x26   :  { %122 = vmatpush.msra.mxu1 %v95_v13 }
  0x28   :  { %123 = vmatpush.msra.mxu1 %v94_v14 }
  0x2a   :  { %124 = vmatpush.msra.mxu1 %v93_v15 }
  0x2c   :  { %125 = vmatpush.msra.mxu1 %v92_v16 }
  0x2e   :  { %126 = vmatpush.msra.mxu1 %v91_v17 }
  0x8d   :  { %v87_v18 = vpop.f32.mrf.mxu0 }
  0x8e   :  { %v90_v19 = vmax.f32 %v87_v18, 0.0 }
  0x90   :  { %127 = vmatmul.f32.vlgmr.msra.gmra.mxu1 %v90_v19 }
 0x10d   :  { %v128_v23 = vpop.f32.mrf.mxu1 }
 0x10e   :  { %v129_v24 = vadd.f32 %v188_v22, %v128_v23 }
 0x110   :  { %131 = vst [vmem:[#allocation8] sm:$0xff] %v129_v24  ;;  %v135_v25 = vsel %vm134_vm1, %v129_v24, -1e+30 }
 0x111   :  { %136 = vmax.xlane.f32.xlu0 %v135_v25  ;;  %156 = dma.vmem_to_hbm [thread:$0]  %s152_s13, 128, %s154_s11, [#allocation4]  }
 0x184   :  { %v137_v26 = vpop.xlane.xlu0 %136 }
 0x185   :  { %v138_v27 = vsub.f32 %v135_v25, %v137_v26 }
 0x187   :  { %v139_v28 = vmul.f32 1.442695, %v138_v27 }
 0x189   :  { %189 = vpow2.f32 %v139_v28 }
 0x18f   :  { %v190_v29 = vpop.eup %189 }
 0x190   :  { %141 = vadd.xlane.f32.xlu0 %v190_v29 }
 0x203   :  { %v142_v30 = vpop.xlane.xlu0 %141 }
 0x204   :  { %191 = vrcp.f32 %v142_v30 }
 0x20a   :  { %v192_v31 = vpop.eup %191 }
 0x20b   :  { %v144_v32 = vmul.f32 %v192_v31, %v190_v29 }
 0x20d   :  { %145 = vst [vmem:[#allocation9] sm:$0xff] %v144_v32 }
 0x20e   :  { %167 = dma.vmem_to_hbm [thread:$0]  %s163_s14, 128, %s165_s17, [#allocation10]  }
 0x20f   :  { %317 = dma.done.wait [#allocation4], 128  }
 0x210   :  { %318 = vsyncadd [#allocation4], 4294967168 }
 0x211   :  { %319 = dma.done.wait [#allocation10], 128  }
 0x212   :  { %320 = vsyncadd [#allocation10], 4294967168 }
 0x213   :  { %176 = vsyncpa [#allocation3], 1 }
 0x214   :  { %177 = vsyncpa [#allocation6], 1 }
 0x215   :  { %178 = vsyncpa [#allocation4], 1 }
 0x216   :  { %179 = vsyncpa [#allocation10], 1 }

</bundles_post_ra>
